<compile_context>
chip_gen: v7x
topology: tpu7x:2x2x1
jax: 0.10.0
libtpu: 0.0.40
codegen_flags: <defaults>
</compile_context>

<pallas_src>
import jax
import jax.numpy as jnp
from jax.experimental import pallas as pl
from jax.experimental.pallas import tpu as pltpu


def _make_hbm_copy_kernel(chunk_rows: int):
    """Each grid step DMAs `chunk_rows` contiguous rows HBM->HBM directly."""

    def kernel(x_hbm, o_hbm, sem):
        i = pl.program_id(0)
        start = pl.multiple_of(i * chunk_rows, chunk_rows)
        cp = pltpu.make_async_copy(
            x_hbm.at[pl.ds(start, chunk_rows)],
            o_hbm.at[pl.ds(start, chunk_rows)],
            sem,
        )
        cp.start()
        cp.wait()

    return kernel


def where_self(x, *, force_kernel: bool = False):
    """torch.ops.aten.where(x1, x1, x1) == x1 exactly (identity)."""
    # Highest-value optimization: the op is the identity, so by default skip
    # the kernel entirely (saves 2 * size bytes of HBM traffic + launch cost).
    if not force_kernel:
        return x

    R, C = x.shape
    # Dtype-aware layout guard: sublane pack is 8 (4B), 16 (2B), 32 (1B);
    # lanes are 128 wide.  Unaligned / tiny shapes just take the identity path.
    pack = max(8, 32 // jnp.dtype(x.dtype).itemsize)
    if R < pack or C < 128 or (R % pack) or (C % 128):
        return x

    # Split the row axis across the grid so both v7x TensorCores get work;
    # each program copies a contiguous, full-width slab with one DMA.
    grid_n = 2 if (R % (2 * pack) == 0 and R >= 2 * pack) else 1
    chunk = R // grid_n

    return pl.pallas_call(
        _make_hbm_copy_kernel(chunk),
        out_shape=jax.ShapeDtypeStruct((R, C), x.dtype),
        grid_spec=pltpu.PrefetchScalarGridSpec(
            num_scalar_prefetch=0,
            grid=(grid_n,),
            # Raw HBM refs on both sides: direct HBM->HBM DMA, no VMEM bounce,
            # no vld/vst slot work, no per-block pipeline overhead.
            in_specs=[pl.BlockSpec(memory_space=pl.ANY)],
            out_specs=pl.BlockSpec(memory_space=pl.ANY),
            scratch_shapes=[pltpu.SemaphoreType.DMA(())],
        ),
        compiler_params=pltpu.CompilerParams(
            dimension_semantics=("parallel",),
        ),
    )(x)


if __name__ == "__main__":
    key = jax.random.PRNGKey(0)

    # Matches the module's x1 = torch.randn(2, 2) -> identity fast path
    # (no kernel launched, which is the recommended behavior for this op).
    x1 = jax.random.normal(key, (2, 2), dtype=jnp.float32)
    out_small = jax.block_until_ready(where_self(x1))
    ref_small = jnp.where(x1 != 0, x1, x1)
    assert out_small.shape == (2, 2)
    assert out_small.dtype == jnp.float32
    assert jnp.allclose(out_small, ref_small)

    # Larger aligned input exercising the Pallas HBM->HBM DMA copy kernel
    # (kept behind force_kernel=True since the default path is a no-op).
    x_big = jax.random.normal(jax.random.PRNGKey(0), (512, 512),
                              dtype=jnp.float32)
    out_big = jax.block_until_ready(where_self(x_big, force_kernel=True))
    ref_big = jnp.where(x_big != 0, x_big, x_big)
    assert out_big.shape == (512, 512)
    assert out_big.dtype == jnp.float32
    assert jnp.array_equal(out_big, ref_big)

    print("KERNEL_OK")
</pallas_src>

<mosaic_0001>
module attributes {stable_mosaic.version = 11 : i64} {
  func.func @kernel(%arg0: i32, %arg1: memref<512x512xf32, #tpu.memory_space<any>>, %arg2: memref<512x512xf32, #tpu.memory_space<any>>, %arg3: memref<!tpu.dma_semaphore, #tpu.memory_space<semaphore_mem>>) attributes {dimension_semantics = [#tpu.dimension_semantics<parallel>], iteration_bounds = array<i64: 2>, scalar_prefetch = 0 : i64, scratch_operands = 1 : i64, tpu.core_type = #tpu.core_type<tc>, window_params = [{}, {}]} {
    %c256_i32 = arith.constant 256 : i32
    %0 = arith.muli %arg0, %c256_i32 : i32
    %1 = tpu.assume_multiple %0, 256 : i32
    %c0_i32 = arith.constant 0 : i32
    %2 = tpu.memref_slice %arg1[%1, %c0_i32] : memref<512x512xf32, #tpu.memory_space<any>> -> memref<256x512xf32, #tpu.memory_space<any>>
    %c0_i32_0 = arith.constant 0 : i32
    %3 = tpu.memref_slice %arg2[%1, %c0_i32_0] : memref<512x512xf32, #tpu.memory_space<any>> -> memref<256x512xf32, #tpu.memory_space<any>>
    tpu.enqueue_dma source(%2 : memref<256x512xf32, #tpu.memory_space<any>>) target(%3 : memref<256x512xf32, #tpu.memory_space<any>>) target_semaphore(%arg3 : memref<!tpu.dma_semaphore, #tpu.memory_space<semaphore_mem>>)
    %c0_i32_1 = arith.constant 0 : i32
    %4 = tpu.memref_slice %arg1[%1, %c0_i32_1] : memref<512x512xf32, #tpu.memory_space<any>> -> memref<256x512xf32, #tpu.memory_space<any>>
    %c0_i32_2 = arith.constant 0 : i32
    %5 = tpu.memref_slice %arg2[%1, %c0_i32_2] : memref<512x512xf32, #tpu.memory_space<any>> -> memref<256x512xf32, #tpu.memory_space<any>>
    tpu.wait_dma2 semaphore(%arg3 : memref<!tpu.dma_semaphore, #tpu.memory_space<semaphore_mem>>) src(%4 : memref<256x512xf32, #tpu.memory_space<any>>) dst(%5 : memref<256x512xf32, #tpu.memory_space<any>>)
    return
  }
}

</mosaic_0001>

<bundles_post_ra>
// kernel: tpu_custom_call.1
= control target key start
LH: loop header
LB: loop body
LE: loop exit
PB: predicated region body
PF: predicated region fallthrough
CT: control target
= control target key end

     0   :  { %s77_s6 = smov 0   ;;  %s100_s0 = inlined_call_operand.hbm [shape: f32[512,512], index: 0, kind: input, shape index: {}]   ;;  %s101_s1 = inlined_call_operand.hbm [shape: f32[512,512], index: 1, kind: output, shape index: {}]  }
   0x1 LB: > { %s53_s7 = sshll.u32 %s79_s6, 8  ;;  %s81_s16 = smov [#allocation2]   ;;  %s79_s6 = sphi %s77_s6, %s11_s6  }
   0x2   : > { %s14_s8 = sshra.s32 %s53_s7, 3  ;;  %s82_s17 = smov [#allocation3]  }
   0x3   : > { %s58_s9 = sshll.u32 %s14_s8, 9  ;;  %s83_s18 = smov 0  }
   0x4   : > { %s18_s12 = scalar_lea.hbm %s100_s0, %s58_s9  ;;  %s20_s15 = scalar_lea.hbm %s101_s1, %s58_s9 }
   0x5   : > { %33 = dma.general %s18_s12, 16384, %s20_s15, %s81_s16, %s82_s17, [#allocation4], %s83_s18, 0  }
   0x6   : > { %75 = dma.done.wait [#allocation2], 16384 }
   0x7   : > { %76 = vsyncadd [#allocation2], 4294950912  ;;  %s11_s6 = sadd.s32 1, %s79_s6  }
   0x8   : > { %p8_p0 = scmp.ge.s32.totalorder %s11_s6, 2  }
   0xa   :  { %10 = sbr.rel (!%p8_p0) target bundleno = 1 (0x1), region = 21 }
  0x11   :  { %38 = vsyncmov [#allocation2] }
  0x14   :  { %s39_s19 = vpop.sfrf %38 }
  0x15   :  { %p57_p1 = scmp.ne.s32.totalorder %s39_s19, 0 }
  0x17   :  { %43 = shalt.err (%p57_p1)  }

</bundles_post_ra>
